<compile_context>
chip_gen: v6e
topology: v6e:2x2x1
jax: 0.10.0
libtpu: 0.0.40
codegen_flags: <defaults>
</compile_context>

<pallas_src>
import functools

import jax
import jax.numpy as jnp
from jax.experimental import pallas as pl
from jax.experimental.pallas import tpu as pltpu


# Matmul operand dtype.  Flip to jnp.bfloat16 on v6e/v7x for ~2x MXU throughput
# and half the operand VMEM traffic (accumulation stays f32); kept f32 here so
# the strict f32 correctness check against the reference holds.
MXU_DTYPE = jnp.float32

# Explicit VMEM budget: per-image tiles here are tiny (<1 MiB), and 48 MiB
# stays under v7x's 64 MiB physical VMEM and far under v5e/v6e's 128 MiB.
_VMEM_LIMIT_BYTES = 48 * 1024 * 1024


def _compiler_params(semantics):
    return pltpu.CompilerParams(dimension_semantics=semantics,
                                vmem_limit_bytes=_VMEM_LIMIT_BYTES)


# ----------------------------- Pallas kernels -------------------------------

def _conv3x3_core(xflat_ref, wt_ref, bias_ref, out_ref, sum_ref, sq_ref,
                  *, H, W, mxu_dtype):
    """One-matmul 3x3 conv on a channel-major flat line buffer + fused BN stats.

    xflat_ref : VMEM scratch [Cin, H*W + 2W + 2]; columns [W+1, W+1+H*W) hold
                the image (channel-major, pixel index p = h*W + w), the W+1
                zero columns on each side absorb every out-of-image row tap.
    wt_ref    : [Cout, 9*Cin], column index (kh*3 + kw)*Cin + ci
    out_ref   : [1, Cout, H*W] raw (pre-BN) conv output for this image
    sum_ref, sq_ref : [1, Cout, 1] per-image BN-stat partials
    """
    HW = H * W
    base = W + 1
    # Lane-index masks for the two taps that cross a row boundary in the flat
    # layout (up/down taps are absorbed by the zero end-padding).
    lane = jax.lax.broadcasted_iota(jnp.int32, (1, HW), 1)
    w_idx = lane % W
    left_ok = w_idx >= 1            # tap kw == 0 reads pixel (h, w-1)
    right_ok = w_idx <= W - 2       # tap kw == 2 reads pixel (h, w+1)

    # In-VMEM im2col: 9 statically shifted, lane-dense [Cin, HW] slices stacked
    # into one [9*Cin, HW] patch matrix -> a single MXU matmul with K = 9*Cin.
    pieces = []
    for t in range(9):
        kh, kw = divmod(t, 3)
        d = (kh - 1) * W + (kw - 1)
        s = xflat_ref[:, pl.ds(base + d, HW)]
        if kw == 0:
            s = jnp.where(left_ok, s, 0.0)
        elif kw == 2:
            s = jnp.where(right_ok, s, 0.0)
        pieces.append(s.astype(mxu_dtype))
    patches = jnp.concatenate(pieces, axis=0)                    # [9*Cin, HW]

    acc = jnp.dot(wt_ref[...].astype(mxu_dtype), patches,
                  preferred_element_type=jnp.float32)            # [Cout, HW]
    acc = acc + bias_ref[...]                                    # [Cout,1] bcast
    # BatchNorm batch statistics accumulated while the tile is still in VMEM.
    sum_ref[0] = jnp.sum(acc, axis=1, keepdims=True)
    sq_ref[0] = jnp.sum(acc * acc, axis=1, keepdims=True)
    out_ref[0] = acc.astype(out_ref.dtype)


def _concat_conv_stats_kernel(xa_ref, xb_ref, wt_ref, bias_ref,
                              out_ref, sum_ref, sq_ref, xflat_ref,
                              *, H, W, mxu_dtype):
    """Fused: channel-concat(x2, up(x1)) -> conv3x3 + bias -> BN stats."""
    HW = H * W
    base = W + 1
    ca = xa_ref.shape[1]
    cb = xb_ref.shape[1]
    # Rebuild the line buffer every step: no cross-step scratch state, so the
    # batch grid axis can be 'parallel' (megacore) without an init guard.
    xflat_ref[...] = jnp.zeros(xflat_ref.shape, xflat_ref.dtype)
    # Channel concat happens directly inside the flat VMEM buffer.
    xflat_ref[pl.ds(0, ca), pl.ds(base, HW)] = xa_ref[0]
    xflat_ref[pl.ds(ca, cb), pl.ds(base, HW)] = xb_ref[0]
    _conv3x3_core(xflat_ref, wt_ref, bias_ref, out_ref, sum_ref, sq_ref,
                  H=H, W=W, mxu_dtype=mxu_dtype)


def _bnrelu_conv_stats_kernel(x_ref, sc_ref, sh_ref, wt_ref, bias_ref,
                              out_ref, sum_ref, sq_ref, xflat_ref,
                              *, H, W, mxu_dtype):
    """Fused: BN+ReLU of the previous conv's raw output (in VMEM)
    -> conv3x3 + bias -> BN stats."""
    HW = H * W
    base = W + 1
    xflat_ref[...] = jnp.zeros(xflat_ref.shape, xflat_ref.dtype)
    x = jnp.maximum(x_ref[0] * sc_ref[...] + sh_ref[...], 0.0)   # BN1 + ReLU
    xflat_ref[:, pl.ds(base, HW)] = x
    _conv3x3_core(xflat_ref, wt_ref, bias_ref, out_ref, sum_ref, sq_ref,
                  H=H, W=W, mxu_dtype=mxu_dtype)


def _bn_relu_kernel(x_ref, sc_ref, sh_ref, o_ref):
    o_ref[0] = jnp.maximum(x_ref[0] * sc_ref[...] + sh_ref[...], 0.0)


# ---------------------------- Pallas wrappers --------------------------------

def concat_conv_stats(xa, xb, wt, bias_col, *, H, W):
    """xa, xb: [N, C*, H*W] channel-major operands of the channel concat."""
    n, ca, hw = xa.shape
    cb = xb.shape[1]
    cout = wt.shape[0]
    pad_hw = hw + 2 * W + 2
    kern = functools.partial(_concat_conv_stats_kernel, H=H, W=W,
                             mxu_dtype=MXU_DTYPE)
    return pl.pallas_call(
        kern,
        out_shape=(jax.ShapeDtypeStruct((n, cout, hw), jnp.float32),
                   jax.ShapeDtypeStruct((n, cout, 1), jnp.float32),
                   jax.ShapeDtypeStruct((n, cout, 1), jnp.float32)),
        grid=(n,),
        in_specs=[
            pl.BlockSpec((1, ca, hw), lambda i: (i, 0, 0)),
            pl.BlockSpec((1, cb, hw), lambda i: (i, 0, 0)),
            pl.BlockSpec((cout, 9 * (ca + cb)), lambda i: (0, 0)),
            pl.BlockSpec((cout, 1), lambda i: (0, 0)),
        ],
        out_specs=(
            pl.BlockSpec((1, cout, hw), lambda i: (i, 0, 0)),
            pl.BlockSpec((1, cout, 1), lambda i: (i, 0, 0)),
            pl.BlockSpec((1, cout, 1), lambda i: (i, 0, 0)),
        ),
        scratch_shapes=[pltpu.VMEM((ca + cb, pad_hw), jnp.float32)],
        compiler_params=_compiler_params(("parallel",)),
    )(xa, xb, wt, bias_col)


def bnrelu_conv_stats(x, in_scale, in_shift, wt, bias_col, *, H, W):
    """x: [N, Cin, H*W] raw (pre-BN) output of the previous conv."""
    n, cin, hw = x.shape
    cout = wt.shape[0]
    pad_hw = hw + 2 * W + 2
    kern = functools.partial(_bnrelu_conv_stats_kernel, H=H, W=W,
                             mxu_dtype=MXU_DTYPE)
    return pl.pallas_call(
        kern,
        out_shape=(jax.ShapeDtypeStruct((n, cout, hw), jnp.float32),
                   jax.ShapeDtypeStruct((n, cout, 1), jnp.float32),
                   jax.ShapeDtypeStruct((n, cout, 1), jnp.float32)),
        grid=(n,),
        in_specs=[
            pl.BlockSpec((1, cin, hw), lambda i: (i, 0, 0)),
            pl.BlockSpec((cin, 1), lambda i: (0, 0)),
            pl.BlockSpec((cin, 1), lambda i: (0, 0)),
            pl.BlockSpec((cout, 9 * cin), lambda i: (0, 0)),
            pl.BlockSpec((cout, 1), lambda i: (0, 0)),
        ],
        out_specs=(
            pl.BlockSpec((1, cout, hw), lambda i: (i, 0, 0)),
            pl.BlockSpec((1, cout, 1), lambda i: (i, 0, 0)),
            pl.BlockSpec((1, cout, 1), lambda i: (i, 0, 0)),
        ),
        scratch_shapes=[pltpu.VMEM((cin, pad_hw), jnp.float32)],
        compiler_params=_compiler_params(("parallel",)),
    )(x, in_scale, in_shift, wt, bias_col)


def bn_relu_channel_major(x, scale_col, shift_col):
    """y = relu(x*scale + shift) on [N, C, H*W] with per-channel columns.

    Lane-dense (H*W lanes) and already NCHW-flattened, so the trailing reshape
    to [N, C, H, W] is free metadata (no transpose pass).
    """
    n, c, hw = x.shape
    return pl.pallas_call(
        _bn_relu_kernel,
        out_shape=jax.ShapeDtypeStruct((n, c, hw), jnp.float32),
        grid=(n,),
        in_specs=[
            pl.BlockSpec((1, c, hw), lambda i: (i, 0, 0)),
            pl.BlockSpec((c, 1), lambda i: (0, 0)),
            pl.BlockSpec((c, 1), lambda i: (0, 0)),
        ],
        out_specs=pl.BlockSpec((1, c, hw), lambda i: (i, 0, 0)),
        compiler_params=_compiler_params(("parallel",)),
    )(x, scale_col, shift_col)


# ------------------------------- JAX glue ------------------------------------

def bilinear_upsample_2x_nchw(x):
    """x: [N,C,H,W] -> [N,C,2H,2W], nn.Upsample(2,'bilinear',align_corners=True)."""
    N, C, H, W = x.shape
    Ho, Wo = 2 * H, 2 * W

    def coords(n_in, n_out):
        if n_in == 1:
            z = jnp.zeros((n_out,), jnp.int32)
            return z, z, jnp.zeros((n_out,), jnp.float32)
        src = jnp.arange(n_out, dtype=jnp.float32) * (n_in - 1) / (n_out - 1)
        i0 = jnp.floor(src).astype(jnp.int32)
        i1 = jnp.minimum(i0 + 1, n_in - 1)
        return i0, i1, src - i0.astype(jnp.float32)

    h0, h1, fh = coords(H, Ho)
    w0, w1, fw = coords(W, Wo)
    top = x[:, :, h0, :]
    bot = x[:, :, h1, :]
    xr = top * (1.0 - fh)[None, None, :, None] + bot * fh[None, None, :, None]
    left = xr[:, :, :, w0]
    right = xr[:, :, :, w1]
    return left * (1.0 - fw)[None, None, None, :] + right * fw[None, None, None, :]


def _bn_affine_from_stats(s, sq, gamma, beta, count, eps=1e-5):
    # s, sq: [C, 1] batch sums.  E[x^2]-E[x]^2 in f32 is cancellation-prone for
    # |mean| >> std; fine at these activation scales.
    mean = s / count
    var = sq / count - mean * mean                 # biased variance (BN batch stats)
    scale = gamma.reshape(-1, 1) * jax.lax.rsqrt(var + eps)
    shift = beta.reshape(-1, 1) - mean * scale
    return scale, shift


def _wt_from_oihw(w_oihw):
    # (Cout, Cin, 3, 3) -> (Cout, 3, 3, Cin) -> (Cout, 9*Cin); col = (kh*3+kw)*Cin+ci
    cout, cin = w_oihw.shape[0], w_oihw.shape[1]
    return jnp.transpose(w_oihw, (0, 2, 3, 1)).reshape(cout, 9 * cin)


@jax.jit
def up_cons_forward(x1, x2, params):
    """x1: [N, Cin, H, W], x2: [N, Cin, 2H, 2W] -> [N, Cout, 2H, 2W] (NCHW)."""
    N, Cin, H1, W1 = x1.shape
    H, W = 2 * H1, 2 * W1

    # Bilinear upsample stays in JAX (gather-based blend weights).
    x1u = bilinear_upsample_2x_nchw(x1)                    # [N, Cin, H, W]
    # Channel-major flattening of NCHW is a free metadata reshape; the channel
    # concat itself is fused into the first conv kernel (no HBM concat copy).
    xa = x2.reshape(N, Cin, H * W)                         # cat order: x2 first
    xb = x1u.reshape(N, Cin, H * W)

    wt1 = _wt_from_oihw(params["w1"])                      # [Cout, 9*2Cin]
    wt2 = _wt_from_oihw(params["w2"])                      # [Cout, 9*Cout]
    cout = wt1.shape[0]
    count = N * H * W

    # conv1 (+ fused concat + per-image BN-stat partials)
    y1, s1, q1 = concat_conv_stats(xa, xb, wt1, params["b1"].reshape(-1, 1),
                                   H=H, W=W)
    sc1, sh1 = _bn_affine_from_stats(jnp.sum(s1, axis=0), jnp.sum(q1, axis=0),
                                     params["g1"], params["be1"], count)

    # conv2 (+ fused BN1+ReLU of its input + per-image BN-stat partials)
    y2, s2, q2 = bnrelu_conv_stats(y1, sc1, sh1, wt2, params["b2"].reshape(-1, 1),
                                   H=H, W=W)
    sc2, sh2 = _bn_affine_from_stats(jnp.sum(s2, axis=0), jnp.sum(q2, axis=0),
                                     params["g2"], params["be2"], count)

    # Final BN2+ReLU stays channel-major and lane-dense; the reshape back to
    # NCHW is free — no transpose anywhere in the pipeline.
    out = bn_relu_channel_major(y2, sc2, sh2)
    return out.reshape(N, cout, H, W)


# --------------------------- pure-JAX reference -------------------------------

def _ref_conv_bn_relu(x_nchw, w, b, g, be, eps=1e-5):
    y = jax.lax.conv_general_dilated(
        x_nchw, w, window_strides=(1, 1), padding=((1, 1), (1, 1)),
        dimension_numbers=("NCHW", "OIHW", "NCHW"))
    y = y + b[None, :, None, None]
    mean = jnp.mean(y, axis=(0, 2, 3), keepdims=True)
    var = jnp.mean((y - mean) ** 2, axis=(0, 2, 3), keepdims=True)
    y = (y - mean) * jax.lax.rsqrt(var + eps)
    y = y * g[None, :, None, None] + be[None, :, None, None]
    return jnp.maximum(y, 0.0)


def up_cons_reference(x1, x2, p):
    x1u = bilinear_upsample_2x_nchw(x1)
    x = jnp.concatenate([x2, x1u], axis=1)
    y = _ref_conv_bn_relu(x, p["w1"], p["b1"], p["g1"], p["be1"])
    y = _ref_conv_bn_relu(y, p["w2"], p["b2"], p["g2"], p["be2"])
    return y


# ----------------------------------- main -------------------------------------

if __name__ == "__main__":
    in_ch, out_ch = 4, 8
    N, H1, W1 = 2, 8, 8                    # x1 spatial; x2 is (2*H1, 2*W1)

    key = jax.random.PRNGKey(0)
    ks = jax.random.split(key, 8)

    x1 = jax.random.normal(ks[0], (N, in_ch, H1, W1), jnp.float32)
    x2 = jax.random.normal(ks[1], (N, in_ch, 2 * H1, 2 * W1), jnp.float32)

    params = {
        # Conv2d(2*in_ch, out_ch, 3) — weight OIHW, bias O
        "w1": jax.random.normal(ks[2], (out_ch, 2 * in_ch, 3, 3), jnp.float32) * 0.1,
        "b1": jax.random.normal(ks[3], (out_ch,), jnp.float32) * 0.1,
        # BatchNorm2d(out_ch, track_running_stats=False) affine params
        "g1": 1.0 + 0.1 * jax.random.normal(ks[4], (out_ch,), jnp.float32),
        "be1": 0.1 * jax.random.normal(ks[5], (out_ch,), jnp.float32),
        # Conv2d(out_ch, out_ch, 3)
        "w2": jax.random.normal(ks[6], (out_ch, out_ch, 3, 3), jnp.float32) * 0.1,
        "b2": jnp.linspace(-0.1, 0.1, out_ch, dtype=jnp.float32),
        "g2": jnp.ones((out_ch,), jnp.float32),
        "be2": jnp.zeros((out_ch,), jnp.float32),
    }

    out = jax.block_until_ready(up_cons_forward(x1, x2, params))
    ref = jax.block_until_ready(up_cons_reference(x1, x2, params))

    assert out.shape == (N, out_ch, 2 * H1, 2 * W1), out.shape
    assert jnp.allclose(out, ref, rtol=1e-3, atol=1e-3), (
        float(jnp.max(jnp.abs(out - ref))))

    print("KERNEL_OK")
</pallas_src>

<mosaic_0001>
module attributes {stable_mosaic.version = 11 : i64} {
  func.func @_concat_conv_stats_kernel(%arg0: i32, %arg1: memref<1x4x256xf32, #tpu.memory_space<vmem>>, %arg2: memref<1x4x256xf32, #tpu.memory_space<vmem>>, %arg3: memref<8x72xf32, #tpu.memory_space<vmem>>, %arg4: memref<8x1xf32, #tpu.memory_space<vmem>>, %arg5: memref<1x8x256xf32, #tpu.memory_space<vmem>>, %arg6: memref<1x8x1xf32, #tpu.memory_space<vmem>>, %arg7: memref<1x8x1xf32, #tpu.memory_space<vmem>>, %arg8: memref<8x290xf32, #tpu.memory_space<vmem>>) attributes {dimension_semantics = [#tpu.dimension_semantics<parallel>], iteration_bounds = array<i64: 2>, scalar_prefetch = 0 : i64, scratch_operands = 1 : i64, tpu.core_type = #tpu.core_type<tc>, window_params = [{transform_indices = @transform_0, window_bounds = array<i64: 1, 4, 256>}, {transform_indices = @transform_1, window_bounds = array<i64: 1, 4, 256>}, {pipeline_mode = #tpu.pipeline_mode<synchronous>, transform_indices = @transform_2, window_bounds = array<i64: 8, 72>}, {pipeline_mode = #tpu.pipeline_mode<synchronous>, transform_indices = @transform_3, window_bounds = array<i64: 8, 1>}, {transform_indices = @transform_4, window_bounds = array<i64: 1, 8, 256>}, {transform_indices = @transform_5, window_bounds = array<i64: 1, 8, 1>}, {transform_indices = @transform_6, window_bounds = array<i64: 1, 8, 1>}]} {
    %cst = arith.constant 0.000000e+00 : f32
    %0 = vector.broadcast %cst : f32 to vector<8x290xf32>
    %c0 = arith.constant 0 : index
    %c0_0 = arith.constant 0 : index
    %1 = vector.load %arg8[%c0, %c0_0] : memref<8x290xf32, #tpu.memory_space<vmem>>, vector<8x290xf32>
    tpu.vector_store %arg8[%c0, %c0_0], %0 {strides = array<i32>} : memref<8x290xf32, #tpu.memory_space<vmem>>, vector<8x290xf32>,
    %c0_1 = arith.constant 0 : index
    %c0_2 = arith.constant 0 : index
    %c0_3 = arith.constant 0 : index
    %2 = vector.load %arg1[%c0_1, %c0_2, %c0_3] : memref<1x4x256xf32, #tpu.memory_space<vmem>>, vector<1x4x256xf32>
    %3 = vector.shape_cast %2 : vector<1x4x256xf32> to vector<4x256xf32>
    %c0_4 = arith.constant 0 : index
    %c17 = arith.constant 17 : index
    %4 = vector.load %arg8[%c0_4, %c17] : memref<8x290xf32, #tpu.memory_space<vmem>>, vector<4x256xf32>
    tpu.vector_store %arg8[%c0_4, %c17], %3 {strides = array<i32>} : memref<8x290xf32, #tpu.memory_space<vmem>>, vector<4x256xf32>,
    %c0_5 = arith.constant 0 : index
    %c0_6 = arith.constant 0 : index
    %c0_7 = arith.constant 0 : index
    %5 = vector.load %arg2[%c0_5, %c0_6, %c0_7] : memref<1x4x256xf32, #tpu.memory_space<vmem>>, vector<1x4x256xf32>
    %6 = vector.shape_cast %5 : vector<1x4x256xf32> to vector<4x256xf32>
    %c4 = arith.constant 4 : index
    %c17_8 = arith.constant 17 : index
    %7 = vector.load %arg8[%c4, %c17_8] : memref<8x290xf32, #tpu.memory_space<vmem>>, vector<4x256xf32>
    tpu.vector_store %arg8[%c4, %c17_8], %6 {strides = array<i32>} : memref<8x290xf32, #tpu.memory_space<vmem>>, vector<4x256xf32>,
    %8 = tpu.iota {dimensions = array<i32: 1>} : vector<1x256xi32>
    %c16_i32 = arith.constant 16 : i32
    %c0_i32 = arith.constant 0 : i32
    %9 = arith.cmpi eq, %c16_i32, %c0_i32 : i32
    %c1_i32 = arith.constant 1 : i32
    %10 = arith.select %9, %c1_i32, %c16_i32 : i32
    %11 = vector.broadcast %10 : i32 to vector<1x256xi32>
    %12 = arith.remsi %8, %11 : vector<1x256xi32>
    %c0_i32_9 = arith.constant 0 : i32
    %13 = vector.broadcast %c0_i32_9 : i32 to vector<1x256xi32>
    %14 = arith.cmpi ne, %12, %13 : vector<1x256xi32>
    %c0_i32_10 = arith.constant 0 : i32
    %15 = vector.broadcast %c0_i32_10 : i32 to vector<1x256xi32>
    %16 = arith.cmpi slt, %12, %15 : vector<1x256xi32>
    %c0_i32_11 = arith.constant 0 : i32
    %17 = arith.cmpi slt, %10, %c0_i32_11 : i32
    %18 = vector.broadcast %17 : i1 to vector<1x256xi1>
    %19 = vector.broadcast %18 : vector<1x256xi1> to vector<1x256xi1>
    %20 = arith.xori %16, %19 : vector<1x256xi1>
    %21 = arith.andi %20, %14 : vector<1x256xi1>
    %22 = vector.broadcast %10 : i32 to vector<1x256xi32>
    %23 = arith.addi %12, %22 : vector<1x256xi32>
    %24 = arith.select %21, %23, %12 : vector<1x256xi1>, vector<1x256xi32>
    %c1_i32_12 = arith.constant 1 : i32
    %25 = vector.broadcast %c1_i32_12 : i32 to vector<1x256xi32>
    %26 = arith.cmpi sge, %24, %25 : vector<1x256xi32>
    %c14_i32 = arith.constant 14 : i32
    %27 = vector.broadcast %c14_i32 : i32 to vector<1x256xi32>
    %28 = arith.cmpi sle, %24, %27 : vector<1x256xi32>
    %c0_13 = arith.constant 0 : index
    %c0_14 = arith.constant 0 : index
    %29 = vector.load %arg8[%c0_13, %c0_14] : memref<8x290xf32, #tpu.memory_space<vmem>>, vector<8x256xf32>
    %cst_15 = arith.constant 0.000000e+00 : f32
    %30 = vector.shape_cast %26 : vector<1x256xi1> to vector<1x256xi1>
    %31 = vector.broadcast %30 : vector<1x256xi1> to vector<8x256xi1>
    %32 = vector.broadcast %cst_15 : f32 to vector<8x256xf32>
    %33 = arith.select %31, %29, %32 : vector<8x256xi1>, vector<8x256xf32>
    %c0_16 = arith.constant 0 : index
    %c1 = arith.constant 1 : index
    %34 = vector.load %arg8[%c0_16, %c1] : memref<8x290xf32, #tpu.memory_space<vmem>>, vector<8x256xf32>
    %c0_17 = arith.constant 0 : index
    %c2 = arith.constant 2 : index
    %35 = vector.load %arg8[%c0_17, %c2] : memref<8x290xf32, #tpu.memory_space<vmem>>, vector<8x256xf32>
    %cst_18 = arith.constant 0.000000e+00 : f32
    %36 = vector.shape_cast %28 : vector<1x256xi1> to vector<1x256xi1>
    %37 = vector.broadcast %36 : vector<1x256xi1> to vector<8x256xi1>
    %38 = vector.broadcast %cst_18 : f32 to vector<8x256xf32>
    %39 = arith.select %37, %35, %38 : vector<8x256xi1>, vector<8x256xf32>
    %c0_19 = arith.constant 0 : index
    %c16 = arith.constant 16 : index
    %40 = vector.load %arg8[%c0_19, %c16] : memref<8x290xf32, #tpu.memory_space<vmem>>, vector<8x256xf32>
    %cst_20 = arith.constant 0.000000e+00 : f32
    %41 = vector.shape_cast %26 : vector<1x256xi1> to vector<1x256xi1>
    %42 = vector.broadcast %41 : vector<1x256xi1> to vector<8x256xi1>
    %43 = vector.broadcast %cst_20 : f32 to vector<8x256xf32>
    %44 = arith.select %42, %40, %43 : vector<8x256xi1>, vector<8x256xf32>
    %c0_21 = arith.constant 0 : index
    %c17_22 = arith.constant 17 : index
    %45 = vector.load %arg8[%c0_21, %c17_22] : memref<8x290xf32, #tpu.memory_space<vmem>>, vector<8x256xf32>
    %c0_23 = arith.constant 0 : index
    %c18 = arith.constant 18 : index
    %46 = vector.load %arg8[%c0_23, %c18] : memref<8x290xf32, #tpu.memory_space<vmem>>, vector<8x256xf32>
    %cst_24 = arith.constant 0.000000e+00 : f32
    %47 = vector.shape_cast %28 : vector<1x256xi1> to vector<1x256xi1>
    %48 = vector.broadcast %47 : vector<1x256xi1> to vector<8x256xi1>
    %49 = vector.broadcast %cst_24 : f32 to vector<8x256xf32>
    %50 = arith.select %48, %46, %49 : vector<8x256xi1>, vector<8x256xf32>
    %c0_25 = arith.constant 0 : index
    %c32 = arith.constant 32 : index
    %51 = vector.load %arg8[%c0_25, %c32] : memref<8x290xf32, #tpu.memory_space<vmem>>, vector<8x256xf32>
    %cst_26 = arith.constant 0.000000e+00 : f32
    %52 = vector.shape_cast %26 : vector<1x256xi1> to vector<1x256xi1>
    %53 = vector.broadcast %52 : vector<1x256xi1> to vector<8x256xi1>
    %54 = vector.broadcast %cst_26 : f32 to vector<8x256xf32>
    %55 = arith.select %53, %51, %54 : vector<8x256xi1>, vector<8x256xf32>
    %c0_27 = arith.constant 0 : index
    %c33 = arith.constant 33 : index
    %56 = vector.load %arg8[%c0_27, %c33] : memref<8x290xf32, #tpu.memory_space<vmem>>, vector<8x256xf32>
    %c0_28 = arith.constant 0 : index
    %c34 = arith.constant 34 : index
    %57 = vector.load %arg8[%c0_28, %c34] : memref<8x290xf32, #tpu.memory_space<vmem>>, vector<8x256xf32>
    %cst_29 = arith.constant 0.000000e+00 : f32
    %58 = vector.shape_cast %28 : vector<1x256xi1> to vector<1x256xi1>
    %59 = vector.broadcast %58 : vector<1x256xi1> to vector<8x256xi1>
    %60 = vector.broadcast %cst_29 : f32 to vector<8x256xf32>
    %61 = arith.select %59, %57, %60 : vector<8x256xi1>, vector<8x256xf32>
    %62 = tpu.concatenate %33, %34, %39, %44, %45, %50, %55, %56, %61 in 0 : vector<8x256xf32>, vector<8x256xf32>, vector<8x256xf32>, vector<8x256xf32>, vector<8x256xf32>, vector<8x256xf32>, vector<8x256xf32>, vector<8x256xf32>, vector<8x256xf32> -> vector<72x256xf32>
    %c0_30 = arith.constant 0 : index
    %c0_31 = arith.constant 0 : index
    %63 = vector.load %arg3[%c0_30, %c0_31] : memref<8x72xf32, #tpu.memory_space<vmem>>, vector<8x72xf32>
    %cst_32 = arith.constant dense<0.000000e+00> : vector<8x256xf32>
    %64 = tpu.matmul %63, %62, %cst_32 {dimension_numbers = #tpu.dot_dimension_numbers<[1], [0], [0], [1], [0, 0, 1, 1], [], []>} : vector<8x72xf32>, vector<72x256xf32>, vector<8x256xf32> -> vector<8x256xf32>
    %c0_33 = arith.constant 0 : index
    %c0_34 = arith.constant 0 : index
    %65 = vector.load %arg4[%c0_33, %c0_34] : memref<8x1xf32, #tpu.memory_space<vmem>>, vector<8x1xf32>
    %66 = vector.broadcast %65 : vector<8x1xf32> to vector<8x256xf32>
    %67 = arith.addf %64, %66 : vector<8x256xf32>
    %cst_35 = arith.constant dense<0.000000e+00> : vector<8xf32>
    %68 = vector.multi_reduction <add>, %67, %cst_35 [1] : vector<8x256xf32> to vector<8xf32>
    %69 = vector.shape_cast %68 : vector<8xf32> to vector<8x1xf32>
    %c0_36 = arith.constant 0 : index
    %c0_37 = arith.constant 0 : index
    %c0_38 = arith.constant 0 : index
    %70 = vector.load %arg6[%c0_36, %c0_37, %c0_38] : memref<1x8x1xf32, #tpu.memory_space<vmem>>, vector<1x8x1xf32>
    %71 = vector.shape_cast %70 : vector<1x8x1xf32> to vector<8x1xf32>
    %72 = vector.shape_cast %69 : vector<8x1xf32> to vector<1x8x1xf32>
    tpu.vector_store %arg6[%c0_36, %c0_37, %c0_38], %72 {strides = array<i32>} : memref<1x8x1xf32, #tpu.memory_space<vmem>>, vector<1x8x1xf32>,
    %73 = arith.mulf %67, %67 : vector<8x256xf32>
    %cst_39 = arith.constant dense<0.000000e+00> : vector<8xf32>
    %74 = vector.multi_reduction <add>, %73, %cst_39 [1] : vector<8x256xf32> to vector<8xf32>
    %75 = vector.shape_cast %74 : vector<8xf32> to vector<8x1xf32>
    %c0_40 = arith.constant 0 : index
    %c0_41 = arith.constant 0 : index
    %c0_42 = arith.constant 0 : index
    %76 = vector.load %arg7[%c0_40, %c0_41, %c0_42] : memref<1x8x1xf32, #tpu.memory_space<vmem>>, vector<1x8x1xf32>
    %77 = vector.shape_cast %76 : vector<1x8x1xf32> to vector<8x1xf32>
    %78 = vector.shape_cast %75 : vector<8x1xf32> to vector<1x8x1xf32>
    tpu.vector_store %arg7[%c0_40, %c0_41, %c0_42], %78 {strides = array<i32>} : memref<1x8x1xf32, #tpu.memory_space<vmem>>, vector<1x8x1xf32>,
    %c0_43 = arith.constant 0 : index
    %c0_44 = arith.constant 0 : index
    %c0_45 = arith.constant 0 : index
    %79 = vector.load %arg5[%c0_43, %c0_44, %c0_45] : memref<1x8x256xf32, #tpu.memory_space<vmem>>, vector<1x8x256xf32>
    %80 = vector.shape_cast %79 : vector<1x8x256xf32> to vector<8x256xf32>
    %81 = vector.shape_cast %67 : vector<8x256xf32> to vector<1x8x256xf32>
    tpu.vector_store %arg5[%c0_43, %c0_44, %c0_45], %81 {strides = array<i32>} : memref<1x8x256xf32, #tpu.memory_space<vmem>>, vector<1x8x256xf32>,
    return
  }
  func.func @transform_0(%arg0: i32) -> (i32, i32, i32) {
    %c0_i32 = arith.constant 0 : i32
    %c0_i32_0 = arith.constant 0 : i32
    %c0_i32_1 = arith.constant 0 : i32
    return %arg0, %c0_i32, %c0_i32_0 : i32, i32, i32
  }
  func.func @transform_1(%arg0: i32) -> (i32, i32, i32) {
    %c0_i32 = arith.constant 0 : i32
    %c0_i32_0 = arith.constant 0 : i32
    %c0_i32_1 = arith.constant 0 : i32
    return %arg0, %c0_i32, %c0_i32_0 : i32, i32, i32
  }
  func.func @transform_2(%arg0: i32) -> (i32, i32) {
    %c0_i32 = arith.constant 0 : i32
    %c0_i32_0 = arith.constant 0 : i32
    %c0_i32_1 = arith.constant 0 : i32
    return %c0_i32, %c0_i32_0 : i32, i32
  }
  func.func @transform_3(%arg0: i32) -> (i32, i32) {
    %c0_i32 = arith.constant 0 : i32
    %c0_i32_0 = arith.constant 0 : i32
    %c0_i32_1 = arith.constant 0 : i32
    return %c0_i32, %c0_i32_0 : i32, i32
  }
  func.func @transform_4(%arg0: i32) -> (i32, i32, i32) {
    %c0_i32 = arith.constant 0 : i32
    %c0_i32_0 = arith.constant 0 : i32
    %c0_i32_1 = arith.constant 0 : i32
    return %arg0, %c0_i32, %c0_i32_0 : i32, i32, i32
  }
  func.func @transform_5(%arg0: i32) -> (i32, i32, i32) {
    %c0_i32 = arith.constant 0 : i32
    %c0_i32_0 = arith.constant 0 : i32
    %c0_i32_1 = arith.constant 0 : i32
    return %arg0, %c0_i32, %c0_i32_0 : i32, i32, i32
  }
  func.func @transform_6(%arg0: i32) -> (i32, i32, i32) {
    %c0_i32 = arith.constant 0 : i32
    %c0_i32_0 = arith.constant 0 : i32
    %c0_i32_1 = arith.constant 0 : i32
    return %arg0, %c0_i32, %c0_i32_0 : i32, i32, i32
  }
}

module attributes {stable_mosaic.version = 11 : i64} {
  func.func @_bn_relu_kernel(%arg0: i32, %arg1: memref<1x8x256xf32, #tpu.memory_space<vmem>>, %arg2: memref<8x1xf32, #tpu.memory_space<vmem>>, %arg3: memref<8x1xf32, #tpu.memory_space<vmem>>, %arg4: memref<1x8x256xf32, #tpu.memory_space<vmem>>) attributes {dimension_semantics = [#tpu.dimension_semantics<parallel>], iteration_bounds = array<i64: 2>, scalar_prefetch = 0 : i64, scratch_operands = 0 : i64, tpu.core_type = #tpu.core_type<tc>, window_params = [{transform_indices = @transform_0, window_bounds = array<i64: 1, 8, 256>}, {pipeline_mode = #tpu.pipeline_mode<synchronous>, transform_indices = @transform_1, window_bounds = array<i64: 8, 1>}, {pipeline_mode = #tpu.pipeline_mode<synchronous>, transform_indices = @transform_2, window_bounds = array<i64: 8, 1>}, {transform_indices = @transform_3, window_bounds = array<i64: 1, 8, 256>}]} {
    %c0 = arith.constant 0 : index
    %c0_0 = arith.constant 0 : index
    %c0_1 = arith.constant 0 : index
    %0 = vector.load %arg1[%c0, %c0_0, %c0_1] : memref<1x8x256xf32, #tpu.memory_space<vmem>>, vector<1x8x256xf32>
    %1 = vector.shape_cast %0 : vector<1x8x256xf32> to vector<8x256xf32>
    %c0_2 = arith.constant 0 : index
    %c0_3 = arith.constant 0 : index
    %2 = vector.load %arg2[%c0_2, %c0_3] : memref<8x1xf32, #tpu.memory_space<vmem>>, vector<8x1xf32>
    %3 = vector.broadcast %2 : vector<8x1xf32> to vector<8x256xf32>
    %4 = arith.mulf %1, %3 : vector<8x256xf32>
    %c0_4 = arith.constant 0 : index
    %c0_5 = arith.constant 0 : index
    %5 = vector.load %arg3[%c0_4, %c0_5] : memref<8x1xf32, #tpu.memory_space<vmem>>, vector<8x1xf32>
    %6 = vector.broadcast %5 : vector<8x1xf32> to vector<8x256xf32>
    %7 = arith.addf %4, %6 : vector<8x256xf32>
    %cst = arith.constant 0.000000e+00 : f32
    %8 = vector.broadcast %cst : f32 to vector<8x256xf32>
    %9 = arith.maximumf %7, %8 : vector<8x256xf32>
    %c0_6 = arith.constant 0 : index
    %c0_7 = arith.constant 0 : index
    %c0_8 = arith.constant 0 : index
    %10 = vector.load %arg4[%c0_6, %c0_7, %c0_8] : memref<1x8x256xf32, #tpu.memory_space<vmem>>, vector<1x8x256xf32>
    %11 = vector.shape_cast %10 : vector<1x8x256xf32> to vector<8x256xf32>
    %12 = vector.shape_cast %9 : vector<8x256xf32> to vector<1x8x256xf32>
    tpu.vector_store %arg4[%c0_6, %c0_7, %c0_8], %12 {strides = array<i32>} : memref<1x8x256xf32, #tpu.memory_space<vmem>>, vector<1x8x256xf32>,
    return
  }
  func.func @transform_0(%arg0: i32) -> (i32, i32, i32) {
    %c0_i32 = arith.constant 0 : i32
    %c0_i32_0 = arith.constant 0 : i32
    %c0_i32_1 = arith.constant 0 : i32
    return %arg0, %c0_i32, %c0_i32_0 : i32, i32, i32
  }
  func.func @transform_1(%arg0: i32) -> (i32, i32) {
    %c0_i32 = arith.constant 0 : i32
    %c0_i32_0 = arith.constant 0 : i32
    %c0_i32_1 = arith.constant 0 : i32
    return %c0_i32, %c0_i32_0 : i32, i32
  }
  func.func @transform_2(%arg0: i32) -> (i32, i32) {
    %c0_i32 = arith.constant 0 : i32
    %c0_i32_0 = arith.constant 0 : i32
    %c0_i32_1 = arith.constant 0 : i32
    return %c0_i32, %c0_i32_0 : i32, i32
  }
  func.func @transform_3(%arg0: i32) -> (i32, i32, i32) {
    %c0_i32 = arith.constant 0 : i32
    %c0_i32_0 = arith.constant 0 : i32
    %c0_i32_1 = arith.constant 0 : i32
    return %arg0, %c0_i32, %c0_i32_0 : i32, i32, i32
  }
}

module attributes {stable_mosaic.version = 11 : i64} {
  func.func @_bnrelu_conv_stats_kernel(%arg0: i32, %arg1: memref<1x8x256xf32, #tpu.memory_space<vmem>>, %arg2: memref<8x1xf32, #tpu.memory_space<vmem>>, %arg3: memref<8x1xf32, #tpu.memory_space<vmem>>, %arg4: memref<8x72xf32, #tpu.memory_space<vmem>>, %arg5: memref<8x1xf32, #tpu.memory_space<vmem>>, %arg6: memref<1x8x256xf32, #tpu.memory_space<vmem>>, %arg7: memref<1x8x1xf32, #tpu.memory_space<vmem>>, %arg8: memref<1x8x1xf32, #tpu.memory_space<vmem>>, %arg9: memref<8x290xf32, #tpu.memory_space<vmem>>) attributes {dimension_semantics = [#tpu.dimension_semantics<parallel>], iteration_bounds = array<i64: 2>, scalar_prefetch = 0 : i64, scratch_operands = 1 : i64, tpu.core_type = #tpu.core_type<tc>, window_params = [{transform_indices = @transform_0, window_bounds = array<i64: 1, 8, 256>}, {pipeline_mode = #tpu.pipeline_mode<synchronous>, transform_indices = @transform_1, window_bounds = array<i64: 8, 1>}, {pipeline_mode = #tpu.pipeline_mode<synchronous>, transform_indices = @transform_2, window_bounds = array<i64: 8, 1>}, {pipeline_mode = #tpu.pipeline_mode<synchronous>, transform_indices = @transform_3, window_bounds = array<i64: 8, 72>}, {pipeline_mode = #tpu.pipeline_mode<synchronous>, transform_indices = @transform_4, window_bounds = array<i64: 8, 1>}, {transform_indices = @transform_5, window_bounds = array<i64: 1, 8, 256>}, {transform_indices = @transform_6, window_bounds = array<i64: 1, 8, 1>}, {transform_indices = @transform_7, window_bounds = array<i64: 1, 8, 1>}]} {
    %cst = arith.constant 0.000000e+00 : f32
    %0 = vector.broadcast %cst : f32 to vector<8x290xf32>
    %c0 = arith.constant 0 : index
    %c0_0 = arith.constant 0 : index
    %1 = vector.load %arg9[%c0, %c0_0] : memref<8x290xf32, #tpu.memory_space<vmem>>, vector<8x290xf32>
    tpu.vector_store %arg9[%c0, %c0_0], %0 {strides = array<i32>} : memref<8x290xf32, #tpu.memory_space<vmem>>, vector<8x290xf32>,
    %c0_1 = arith.constant 0 : index
    %c0_2 = arith.constant 0 : index
    %c0_3 = arith.constant 0 : index
    %2 = vector.load %arg1[%c0_1, %c0_2, %c0_3] : memref<1x8x256xf32, #tpu.memory_space<vmem>>, vector<1x8x256xf32>
    %3 = vector.shape_cast %2 : vector<1x8x256xf32> to vector<8x256xf32>
    %c0_4 = arith.constant 0 : index
    %c0_5 = arith.constant 0 : index
    %4 = vector.load %arg2[%c0_4, %c0_5] : memref<8x1xf32, #tpu.memory_space<vmem>>, vector<8x1xf32>
    %5 = vector.broadcast %4 : vector<8x1xf32> to vector<8x256xf32>
    %6 = arith.mulf %3, %5 : vector<8x256xf32>
    %c0_6 = arith.constant 0 : index
    %c0_7 = arith.constant 0 : index
    %7 = vector.load %arg3[%c0_6, %c0_7] : memref<8x1xf32, #tpu.memory_space<vmem>>, vector<8x1xf32>
    %8 = vector.broadcast %7 : vector<8x1xf32> to vector<8x256xf32>
    %9 = arith.addf %6, %8 : vector<8x256xf32>
    %cst_8 = arith.constant 0.000000e+00 : f32
    %10 = vector.broadcast %cst_8 : f32 to vector<8x256xf32>
    %11 = arith.maximumf %9, %10 : vector<8x256xf32>
    %c0_9 = arith.constant 0 : index
    %c17 = arith.constant 17 : index
    %12 = vector.load %arg9[%c0_9, %c17] : memref<8x290xf32, #tpu.memory_space<vmem>>, vector<8x256xf32>
    tpu.vector_store %arg9[%c0_9, %c17], %11 {strides = array<i32>} : memref<8x290xf32, #tpu.memory_space<vmem>>, vector<8x256xf32>,
    %13 = tpu.iota {dimensions = array<i32: 1>} : vector<1x256xi32>
    %c16_i32 = arith.constant 16 : i32
    %c0_i32 = arith.constant 0 : i32
    %14 = arith.cmpi eq, %c16_i32, %c0_i32 : i32
    %c1_i32 = arith.constant 1 : i32
    %15 = arith.select %14, %c1_i32, %c16_i32 : i32
    %16 = vector.broadcast %15 : i32 to vector<1x256xi32>
    %17 = arith.remsi %13, %16 : vector<1x256xi32>
    %c0_i32_10 = arith.constant 0 : i32
    %18 = vector.broadcast %c0_i32_10 : i32 to vector<1x256xi32>
    %19 = arith.cmpi ne, %17, %18 : vector<1x256xi32>
    %c0_i32_11 = arith.constant 0 : i32
    %20 = vector.broadcast %c0_i32_11 : i32 to vector<1x256xi32>
    %21 = arith.cmpi slt, %17, %20 : vector<1x256xi32>
    %c0_i32_12 = arith.constant 0 : i32
    %22 = arith.cmpi slt, %15, %c0_i32_12 : i32
    %23 = vector.broadcast %22 : i1 to vector<1x256xi1>
    %24 = vector.broadcast %23 : vector<1x256xi1> to vector<1x256xi1>
    %25 = arith.xori %21, %24 : vector<1x256xi1>
    %26 = arith.andi %25, %19 : vector<1x256xi1>
    %27 = vector.broadcast %15 : i32 to vector<1x256xi32>
    %28 = arith.addi %17, %27 : vector<1x256xi32>
    %29 = arith.select %26, %28, %17 : vector<1x256xi1>, vector<1x256xi32>
    %c1_i32_13 = arith.constant 1 : i32
    %30 = vector.broadcast %c1_i32_13 : i32 to vector<1x256xi32>
    %31 = arith.cmpi sge, %29, %30 : vector<1x256xi32>
    %c14_i32 = arith.constant 14 : i32
    %32 = vector.broadcast %c14_i32 : i32 to vector<1x256xi32>
    %33 = arith.cmpi sle, %29, %32 : vector<1x256xi32>
    %c0_14 = arith.constant 0 : index
    %c0_15 = arith.constant 0 : index
    %34 = vector.load %arg9[%c0_14, %c0_15] : memref<8x290xf32, #tpu.memory_space<vmem>>, vector<8x256xf32>
    %cst_16 = arith.constant 0.000000e+00 : f32
    %35 = vector.shape_cast %31 : vector<1x256xi1> to vector<1x256xi1>
    %36 = vector.broadcast %35 : vector<1x256xi1> to vector<8x256xi1>
    %37 = vector.broadcast %cst_16 : f32 to vector<8x256xf32>
    %38 = arith.select %36, %34, %37 : vector<8x256xi1>, vector<8x256xf32>
    %c0_17 = arith.constant 0 : index
    %c1 = arith.constant 1 : index
    %39 = vector.load %arg9[%c0_17, %c1] : memref<8x290xf32, #tpu.memory_space<vmem>>, vector<8x256xf32>
    %c0_18 = arith.constant 0 : index
    %c2 = arith.constant 2 : index
    %40 = vector.load %arg9[%c0_18, %c2] : memref<8x290xf32, #tpu.memory_space<vmem>>, vector<8x256xf32>
    %cst_19 = arith.constant 0.000000e+00 : f32
    %41 = vector.shape_cast %33 : vector<1x256xi1> to vector<1x256xi1>
    %42 = vector.broadcast %41 : vector<1x256xi1> to vector<8x256xi1>
    %43 = vector.broadcast %cst_19 : f32 to vector<8x256xf32>
    %44 = arith.select %42, %40, %43 : vector<8x256xi1>, vector<8x256xf32>
    %c0_20 = arith.constant 0 : index
    %c16 = arith.constant 16 : index
    %45 = vector.load %arg9[%c0_20, %c16] : memref<8x290xf32, #tpu.memory_space<vmem>>, vector<8x256xf32>
    %cst_21 = arith.constant 0.000000e+00 : f32
    %46 = vector.shape_cast %31 : vector<1x256xi1> to vector<1x256xi1>
    %47 = vector.broadcast %46 : vector<1x256xi1> to vector<8x256xi1>
    %48 = vector.broadcast %cst_21 : f32 to vector<8x256xf32>
    %49 = arith.select %47, %45, %48 : vector<8x256xi1>, vector<8x256xf32>
    %c0_22 = arith.constant 0 : index
    %c17_23 = arith.constant 17 : index
    %50 = vector.load %arg9[%c0_22, %c17_23] : memref<8x290xf32, #tpu.memory_space<vmem>>, vector<8x256xf32>
    %c0_24 = arith.constant 0 : index
    %c18 = arith.constant 18 : index
    %51 = vector.load %arg9[%c0_24, %c18] : memref<8x290xf32, #tpu.memory_space<vmem>>, vector<8x256xf32>
    %cst_25 = arith.constant 0.000000e+00 : f32
    %52 = vector.shape_cast %33 : vector<1x256xi1> to vector<1x256xi1>
    %53 = vector.broadcast %52 : vector<1x256xi1> to vector<8x256xi1>
    %54 = vector.broadcast %cst_25 : f32 to vector<8x256xf32>
    %55 = arith.select %53, %51, %54 : vector<8x256xi1>, vector<8x256xf32>
    %c0_26 = arith.constant 0 : index
    %c32 = arith.constant 32 : index
    %56 = vector.load %arg9[%c0_26, %c32] : memref<8x290xf32, #tpu.memory_space<vmem>>, vector<8x256xf32>
    %cst_27 = arith.constant 0.000000e+00 : f32
    %57 = vector.shape_cast %31 : vector<1x256xi1> to vector<1x256xi1>
    %58 = vector.broadcast %57 : vector<1x256xi1> to vector<8x256xi1>
    %59 = vector.broadcast %cst_27 : f32 to vector<8x256xf32>
    %60 = arith.select %58, %56, %59 : vector<8x256xi1>, vector<8x256xf32>
    %c0_28 = arith.constant 0 : index
    %c33 = arith.constant 33 : index
    %61 = vector.load %arg9[%c0_28, %c33] : memref<8x290xf32, #tpu.memory_space<vmem>>, vector<8x256xf32>
    %c0_29 = arith.constant 0 : index
    %c34 = arith.constant 34 : index
    %62 = vector.load %arg9[%c0_29, %c34] : memref<8x290xf32, #tpu.memory_space<vmem>>, vector<8x256xf32>
    %cst_30 = arith.constant 0.000000e+00 : f32
    %63 = vector.shape_cast %33 : vector<1x256xi1> to vector<1x256xi1>
    %64 = vector.broadcast %63 : vector<1x256xi1> to vector<8x256xi1>
    %65 = vector.broadcast %cst_30 : f32 to vector<8x256xf32>
    %66 = arith.select %64, %62, %65 : vector<8x256xi1>, vector<8x256xf32>
    %67 = tpu.concatenate %38, %39, %44, %49, %50, %55, %60, %61, %66 in 0 : vector<8x256xf32>, vector<8x256xf32>, vector<8x256xf32>, vector<8x256xf32>, vector<8x256xf32>, vector<8x256xf32>, vector<8x256xf32>, vector<8x256xf32>, vector<8x256xf32> -> vector<72x256xf32>
    %c0_31 = arith.constant 0 : index
    %c0_32 = arith.constant 0 : index
    %68 = vector.load %arg4[%c0_31, %c0_32] : memref<8x72xf32, #tpu.memory_space<vmem>>, vector<8x72xf32>
    %cst_33 = arith.constant dense<0.000000e+00> : vector<8x256xf32>
    %69 = tpu.matmul %68, %67, %cst_33 {dimension_numbers = #tpu.dot_dimension_numbers<[1], [0], [0], [1], [0, 0, 1, 1], [], []>} : vector<8x72xf32>, vector<72x256xf32>, vector<8x256xf32> -> vector<8x256xf32>
    %c0_34 = arith.constant 0 : index
    %c0_35 = arith.constant 0 : index
    %70 = vector.load %arg5[%c0_34, %c0_35] : memref<8x1xf32, #tpu.memory_space<vmem>>, vector<8x1xf32>
    %71 = vector.broadcast %70 : vector<8x1xf32> to vector<8x256xf32>
    %72 = arith.addf %69, %71 : vector<8x256xf32>
    %cst_36 = arith.constant dense<0.000000e+00> : vector<8xf32>
    %73 = vector.multi_reduction <add>, %72, %cst_36 [1] : vector<8x256xf32> to vector<8xf32>
    %74 = vector.shape_cast %73 : vector<8xf32> to vector<8x1xf32>
    %c0_37 = arith.constant 0 : index
    %c0_38 = arith.constant 0 : index
    %c0_39 = arith.constant 0 : index
    %75 = vector.load %arg7[%c0_37, %c0_38, %c0_39] : memref<1x8x1xf32, #tpu.memory_space<vmem>>, vector<1x8x1xf32>
    %76 = vector.shape_cast %75 : vector<1x8x1xf32> to vector<8x1xf32>
    %77 = vector.shape_cast %74 : vector<8x1xf32> to vector<1x8x1xf32>
    tpu.vector_store %arg7[%c0_37, %c0_38, %c0_39], %77 {strides = array<i32>} : memref<1x8x1xf32, #tpu.memory_space<vmem>>, vector<1x8x1xf32>,
    %78 = arith.mulf %72, %72 : vector<8x256xf32>
    %cst_40 = arith.constant dense<0.000000e+00> : vector<8xf32>
    %79 = vector.multi_reduction <add>, %78, %cst_40 [1] : vector<8x256xf32> to vector<8xf32>
    %80 = vector.shape_cast %79 : vector<8xf32> to vector<8x1xf32>
    %c0_41 = arith.constant 0 : index
    %c0_42 = arith.constant 0 : index
    %c0_43 = arith.constant 0 : index
    %81 = vector.load %arg8[%c0_41, %c0_42, %c0_43] : memref<1x8x1xf32, #tpu.memory_space<vmem>>, vector<1x8x1xf32>
    %82 = vector.shape_cast %81 : vector<1x8x1xf32> to vector<8x1xf32>
    %83 = vector.shape_cast %80 : vector<8x1xf32> to vector<1x8x1xf32>
    tpu.vector_store %arg8[%c0_41, %c0_42, %c0_43], %83 {strides = array<i32>} : memref<1x8x1xf32, #tpu.memory_space<vmem>>, vector<1x8x1xf32>,
    %c0_44 = arith.constant 0 : index
    %c0_45 = arith.constant 0 : index
    %c0_46 = arith.constant 0 : index
    %84 = vector.load %arg6[%c0_44, %c0_45, %c0_46] : memref<1x8x256xf32, #tpu.memory_space<vmem>>, vector<1x8x256xf32>
    %85 = vector.shape_cast %84 : vector<1x8x256xf32> to vector<8x256xf32>
    %86 = vector.shape_cast %72 : vector<8x256xf32> to vector<1x8x256xf32>
    tpu.vector_store %arg6[%c0_44, %c0_45, %c0_46], %86 {strides = array<i32>} : memref<1x8x256xf32, #tpu.memory_space<vmem>>, vector<1x8x256xf32>,
    return
  }
  func.func @transform_0(%arg0: i32) -> (i32, i32, i32) {
    %c0_i32 = arith.constant 0 : i32
    %c0_i32_0 = arith.constant 0 : i32
    %c0_i32_1 = arith.constant 0 : i32
    return %arg0, %c0_i32, %c0_i32_0 : i32, i32, i32
  }
  func.func @transform_1(%arg0: i32) -> (i32, i32) {
    %c0_i32 = arith.constant 0 : i32
    %c0_i32_0 = arith.constant 0 : i32
    %c0_i32_1 = arith.constant 0 : i32
    return %c0_i32, %c0_i32_0 : i32, i32
  }
  func.func @transform_2(%arg0: i32) -> (i32, i32) {
    %c0_i32 = arith.constant 0 : i32
    %c0_i32_0 = arith.constant 0 : i32
    %c0_i32_1 = arith.constant 0 : i32
    return %c0_i32, %c0_i32_0 : i32, i32
  }
  func.func @transform_3(%arg0: i32) -> (i32, i32) {
    %c0_i32 = arith.constant 0 : i32
    %c0_i32_0 = arith.constant 0 : i32
    %c0_i32_1 = arith.constant 0 : i32
    return %c0_i32, %c0_i32_0 : i32, i32
  }
  func.func @transform_4(%arg0: i32) -> (i32, i32) {
    %c0_i32 = arith.constant 0 : i32
    %c0_i32_0 = arith.constant 0 : i32
    %c0_i32_1 = arith.constant 0 : i32
    return %c0_i32, %c0_i32_0 : i32, i32
  }
  func.func @transform_5(%arg0: i32) -> (i32, i32, i32) {
    %c0_i32 = arith.constant 0 : i32
    %c0_i32_0 = arith.constant 0 : i32
    %c0_i32_1 = arith.constant 0 : i32
    return %arg0, %c0_i32, %c0_i32_0 : i32, i32, i32
  }
  func.func @transform_6(%arg0: i32) -> (i32, i32, i32) {
    %c0_i32 = arith.constant 0 : i32
    %c0_i32_0 = arith.constant 0 : i32
    %c0_i32_1 = arith.constant 0 : i32
    return %arg0, %c0_i32, %c0_i32_0 : i32, i32, i32
  }
  func.func @transform_7(%arg0: i32) -> (i32, i32, i32) {
    %c0_i32 = arith.constant 0 : i32
    %c0_i32_0 = arith.constant 0 : i32
    %c0_i32_1 = arith.constant 0 : i32
    return %arg0, %c0_i32, %c0_i32_0 : i32, i32, i32
  }
}

</mosaic_0001>

<bundles_post_ra>
// kernel: up_cons_forward.5
= control target key start
LH: loop header
LB: loop body
LE: loop exit
PB: predicated region body
PF: predicated region fallthrough
CT: control target
= control target key end

     0   :  { %s300_s12 = smov 0   ;;  %s323_s0 = inlined_call_operand.vmem [shape: f32[2,8,256], index: 0, kind: input, shape index: {}]   ;;  %s324_s1 = inlined_call_operand.vmem [shape: f32[8,1], index: 1, kind: input, shape index: {}]   ;;  %s325_s2 = inlined_call_operand.vmem [shape: f32[8,1], index: 2, kind: input, shape index: {}]   ;;  %s326_s3 = inlined_call_operand.vmem [shape: f32[2,8,256], index: 3, kind: output, shape index: {}]  }
   0x1 LB: > { %s248_s13 = sadd.s32 4294967295, %s277_s12   ;;  %p252_p0 = scmp.ge.s32.totalorder %s277_s12, 1  ;;  %s277_s12 = sphi %s300_s12, %s13_s12  }
   0x2   : > { %p137_p1 = scmp.lt.s32.totalorder %s277_s12, 3 }
   0x4   : > { %p138_p2 = pnand %p252_p0, %p137_p1 }
   0x5   : > { %p161_p3 = scmp.lt.s32.totalorder (!%p138_p2), %s248_s13, 1 }
   0x6   : > { %141 = sbr.rel (%p138_p2) target bundleno = 146 (0x92), region = 32 }
   0xb   : > { %v173_v0 = vld [vmem:[%s324_s1] sm:$0xff]  ;;  %v279_v1 = vmov 0   ;;  %s328_s13 = smov (!%p161_p3, %s248_s13), 1 }
   0xc   : > { %270 = vset.pattern.permute.xlu0 %v279_v1  ;;  %v181_v2 = vld [vmem:[%s325_s2] sm:$0xff]  ;;  %s259_s18 = sshll.u32 %s328_s13, 4 }
   0xd   : > { %176 = vperm.xlu0 %270, %v173_v0   ;;  %s165_s21 = scalar_lea.vmem %s323_s0, %s259_s18  ;;  %s170_s24 = scalar_lea.vmem %s326_s3, %s259_s18 }
   0xe   : > { %v171_v4 = vld [vmem:[%s165_s21] sm:$0xff]  ;;  %v172_v5 = vld [vmem:[%s165_s21 + $0x8] sm:$0xff] }
  0x11   : > { %184 = vperm.xlu0 %270, %v181_v2  }
  0x88   : > { %v177_v3 = vpop.permute.xlu0 %176 }
  0x89   : > { %v179_v6 = vmul.f32 %v177_v3, %v171_v4  ;;  %v180_v7 = vmul.f32 %v177_v3, %v172_v5 }
  0x8c   : > { %v185_v8 = vpop.permute.xlu0 %184 }
  0x8d   : > { %v187_v9 = vadd.f32 %v185_v8, %v179_v6  ;;  %v188_v10 = vadd.f32 %v185_v8, %v180_v7 }
  0x8f   : > { %v189_v11 = vmax.f32 %v187_v9, 0.0  ;;  %v190_v12 = vmax.f32 %v188_v10, 0.0 }
  0x91   : > { %191 = vst [vmem:[%s170_s24] sm:$0xff] %v189_v11  ;;  %192 = vst [vmem:[%s170_s24 + $0x8] sm:$0xff] %v190_v12 }
  0x92 PF: > { %s13_s12 = sadd.s32 1, %s277_s12  }
  0x93   : > { %p10_p4 = scmp.ge.s32.totalorder %s13_s12, 4  }
  0x95   :  { %12 = sbr.rel (!%p10_p4) target bundleno = 1 (0x1), region = 62 }

// kernel: up_cons_forward.4
= control target key start
LH: loop header
LB: loop body
LE: loop exit
PB: predicated region body
PF: predicated region fallthrough
CT: control target
= control target key end

     0   :  { %s803_s24 = smov 0   ;;  %s908_s0 = inlined_call_operand.vmem [shape: f32[2,8,256], index: 0, kind: input, shape index: {}]   ;;  %s909_s1 = inlined_call_operand.vmem [shape: f32[8,1], index: 1, kind: input, shape index: {}]   ;;  %s910_s2 = inlined_call_operand.vmem [shape: f32[8,1], index: 2, kind: input, shape index: {}]   ;;  %s911_s3 = inlined_call_operand.vmem [shape: f32[8,72], index: 3, kind: input, shape index: {}]   ;;  %s912_s4 = inlined_call_operand.vmem [shape: f32[8,1], index: 4, kind: input, shape index: {}]   ;;  %s913_s5 = inlined_call_operand.vmem [shape: f32[2,8,256], index: 5, kind: output, shape index: {0}]   ;;  %s914_s6 = inlined_call_operand.vmem [shape: f32[2,8,1], index: 6, kind: output, shape index: {1}]   ;;  %s915_s7 = inlined_call_operand.vmem [shape: f32[2,8,1], index: 7, kind: output, shape index: {2}]  }
   0x1 LB: > { %s696_s25 = sadd.s32 4294967295, %s750_s24   ;;  %p700_p0 = scmp.ge.s32.totalorder %s750_s24, 1  ;;  %s750_s24 = sphi %s803_s24, %s18_s24  }
   0x2   : > { %p242_p1 = scmp.lt.s32.totalorder %s750_s24, 3 }
   0x4   : > { %p243_p2 = pnand %p700_p0, %p242_p1 }
   0x5   : > { %p282_p3 = scmp.lt.s32.totalorder (!%p243_p2), %s696_s25, 1  ;;  %s754_s11 = smov (!%p243_p2), 17  }
   0x6   : > { %246 = sbr.rel (%p243_p2) target bundleno = 775 (0x307), region = 40  ;;  %s755_s12 = smov (!%p243_p2), 94  }
   0x7   : > { %s756_s13 = smov (!%p243_p2), 95   ;;  %s757_s14 = smov (!%p243_p2), 96  }
   0x8   : > { %s758_s15 = smov (!%p243_p2), 110   ;;  %s759_s16 = smov (!%p243_p2), 111  }
   0x9   : > { %s760_s17 = smov (!%p243_p2), 112   ;;  %s761_s18 = smov (!%p243_p2), 126  }
   0xa   : > { %s762_s19 = smov (!%p243_p2), 127  }
   0xb   : > { %v306_v0 = vld [vmem:[%s909_s1] sm:$0xff]  ;;  %v752_v1 = vmov 0   ;;  %v753_v3 = vmov 0.0   ;;  %s925_s25 = smov (!%p282_p3, %s696_s25), 1  ;;  %vm302_vm0 = vcmask 277504   ;;  %vm335_vm1 = vcmask 1047688  }
   0xc   : > { %743 = vset.pattern.permute.xlu0 %v752_v1  ;;  %v314_v2 = vld [vmem:[%s910_s2] sm:$0xff]  ;;  %300 = vst [vmem:[#allocation2] sm:$0xff] %v753_v3  ;;  %559 = vmatprep.mubr.f32.mxu0 %v753_v3  ;;  %s722_s30 = sshll.u32 %s925_s25, 4  ;;  %303 = vst.msk [vmem:[#allocation2 + $0x10] sm:$0xff] %vm302_vm0, %v753_v3  ;;  %vm330_vm2 = vcmask 138240   ;;  %v339_v25 = vlaneseq  ;;  %vm444_vm3 = vcmask 769024  }
   0xd   : > { %309 = vperm.xlu0 %743, %v306_v0   ;;  %s286_s10 = scalar_lea.vmem %s908_s0, %s722_s30  ;;  %v485_v19 = vld [vmem:[%s912_s4] sm:$0xff]  ;;  %vm479_vm6 = vcmask 777216   ;;  %vm431_vm7 = vcmask 785408   ;;  %vm418_vm9 = vcmask 900096   ;;  %vm468_vm11 = vcmask 908288   ;;  %s291_s28 = scalar_lea.vmem %s913_s5, %s722_s30 }
   0xe   : > { %v304_v5 = vld [vmem:[%s286_s10] sm:$0xff]  ;;  %v305_v6 = vld [vmem:[%s286_s10 + $0x8] sm:$0xff]  ;;  %v340_v28 = vand.u32 127, %v339_v25  ;;  %vm405_vm12 = vcmask 916480   ;;  %vm392_vm13 = vcmask 1031168   ;;  %vm457_vm14 = vcmask 1039360  }
   0xf   : > { %vm491_vm15 = vcmask 588800   ;;  %s705_s29 = sshll.u32 %s925_s25, 3  ;;  %vm569_vm0 = vcmask 7168  }
  0x10   : > { %v341_v31 = vadd.s32 128, %v340_v28  ;;  %v346_v37 = vand.u32 15, %v340_v28  ;;  %s295_s10 = scalar_lea.vmem %s914_s6, %s705_s29 }
  0x11   : > { %317 = vperm.xlu0 %743, %v314_v2  }
  0x12   : > { %v353_v34 = vand.u32 15, %v341_v31  ;;  %vm852_vm5 = vcmp.le.s32.totalorder %v346_v37, 14  ;;  %vm864_vm10 = vcmp.ge.s32.totalorder %v346_v37, 1 }
  0x14   : > { %vm848_vm4 = vcmp.le.s32.totalorder %v353_v34, 14  ;;  %vm860_vm8 = vcmp.ge.s32.totalorder %v353_v34, 1 }
  0x88   : > { %v310_v4 = vpop.permute.xlu0 %309 }
  0x89   : > { %v312_v7 = vmul.f32 %v310_v4, %v304_v5  ;;  %v313_v9 = vmul.f32 %v310_v4, %v305_v6  ;;  %v484_v5 = vld [vmem:[%s911_s3] sm:$0xff] }
  0x8c   : > { %v318_v8 = vpop.permute.xlu0 %317 }
  0x8d   : > { %v320_v10 = vadd.f32 %v318_v8, %v312_v7  ;;  %v321_v11 = vadd.f32 %v318_v8, %v313_v9 }
  0x8f   : > { %v322_v12 = vmax.f32 %v320_v10, 0.0  ;;  %v323_v13 = vmax.f32 %v321_v11, 0.0 }
  0x91   : > { %326 = vrot.lane.b32.xlu1 %v322_v12, %s754_s11 }
  0x95   : > { %328 = vrot.lane.b32.xlu1 %v323_v13, %s754_s11 }
 0x103   : > { %v327_v14 = vpop.permute.xlu1 %326 }
 0x104   : > { %336 = vst.msk [vmem:[#allocation2] sm:$0xff] %vm335_vm1, %v327_v14 }
 0x107   : > { %v329_v15 = vpop.permute.xlu1 %328 }
 0x108   : > { %v825_v16 = vsel %vm330_vm2, %v327_v14, %v329_v15  ;;  %338 = vst.msk [vmem:[#allocation2 + $0x10] sm:$0xff] %vm330_vm2, %v329_v15 }
 0x10b   : > { %v827_v17 = vld [vmem:[#allocation2] sm:$0xff] }
 0x10c   : > { %438 = vrot.lane.b32.xlu0 %v827_v17, %s755_s12 }
 0x10f   : > { %v378_v18 = vld [vmem:[#allocation2 + $0x10] sm:$0xff] }
 0x110   : > { %477 = vrot.lane.b32.xlu0 %v378_v18, %s756_s13  ;;  %442 = vrot.lane.b32.xlu1 %v378_v18, %s755_s12 }
 0x114   : > { %425 = vrot.lane.b32.xlu0 %v827_v17, %s757_s14  ;;  %473 = vrot.lane.b32.xlu1 %v827_v17, %s756_s13 }
 0x118   : > { %416 = vrot.lane.b32.xlu0 %v378_v18, %s758_s15  ;;  %429 = vrot.lane.b32.xlu1 %v378_v18, %s757_s14 }
 0x11c   : > { %462 = vrot.lane.b32.xlu0 %v827_v17, %s759_s16  ;;  %412 = vrot.lane.b32.xlu1 %v827_v17, %s758_s15 }
 0x120   : > { %403 = vrot.lane.b32.xlu0 %v378_v18, %s760_s17  ;;  %466 = vrot.lane.b32.xlu1 %v378_v18, %s759_s16 }
 0x124   : > { %386 = vrot.lane.b32.xlu0 %v827_v17, %s761_s18  ;;  %399 = vrot.lane.b32.xlu1 %v827_v17, %s760_s17 }
 0x128   : > { %390 = vrot.lane.b32.xlu1 %v378_v18, %s761_s18  ;;  %440 = vrot.lane.b32.xlu0 %v825_v16, %s755_s12  ;;  %s299_s12 = scalar_lea.vmem %s915_s7, %s705_s29 }
 0x12c   : > { %475 = vrot.lane.b32.xlu1 %v825_v16, %s756_s13  ;;  %427 = vrot.lane.b32.xlu0 %v825_v16, %s757_s14 }
 0x130   : > { %414 = vrot.lane.b32.xlu1 %v825_v16, %s758_s15  ;;  %464 = vrot.lane.b32.xlu0 %v825_v16, %s759_s16 }
 0x134   : > { %401 = vrot.lane.b32.xlu1 %v825_v16, %s760_s17  ;;  %388 = vrot.lane.b32.xlu0 %v825_v16, %s761_s18 }
 0x138   : > { %453 = vrot.lane.b32.xlu1 %v825_v16, %s762_s19  ;;  %455 = vrot.lane.b32.xlu0 %v378_v18, %s762_s19 }
 0x13c   : > { %451 = vrot.lane.b32.xlu1 %v827_v17, %s762_s19  ;;  %488 = vperm.xlu0 %743, %v485_v19  }
 0x17e   : > { %v439_v20 = vpop.permute.xlu0 %438 }
 0x182   : > { %v478_v21 = vpop.permute.xlu0 %477  ;;  %v443_v22 = vpop.permute.xlu1 %442 }
 0x186   : > { %v426_v23 = vpop.permute.xlu0 %425  ;;  %v474_v24 = vpop.permute.xlu1 %473 }
 0x18a   : > { %v417_v26 = vpop.permute.xlu0 %416  ;;  %v430_v27 = vpop.permute.xlu1 %429 }
 0x18e   : > { %v463_v29 = vpop.permute.xlu0 %462  ;;  %v413_v30 = vpop.permute.xlu1 %412 }
 0x192   : > { %v404_v32 = vpop.permute.xlu0 %403  ;;  %v467_v33 = vpop.permute.xlu1 %466 }
 0x196   : > { %v387_v35 = vpop.permute.xlu0 %386  ;;  %v400_v36 = vpop.permute.xlu1 %399 }
 0x19a   : > { %v391_v39 = vpop.permute.xlu1 %390  ;;  %v441_v40 = vpop.permute.xlu0 %440 }
 0x19b   : > { %v446_v42 = vsel %vm444_vm3, %v441_v40, %v443_v22  ;;  %v445_v43 = vsel %vm444_vm3, %v439_v20, %v441_v40 }
 0x19c   : > { %707 = vmatprep.subr.msk.mxu0 %vm848_vm4, %v446_v42 }
 0x19d   : > { %708 = vmatpush1.msk.msra.mxu0 %vm852_vm5, %v445_v43 }
 0x19e   : > { %v476_v44 = vpop.permute.xlu1 %475  ;;  %v428_v45 = vpop.permute.xlu0 %427 }
 0x19f   : > { %v481_v46 = vsel %vm479_vm6, %v476_v44, %v478_v21  ;;  %v480_v47 = vsel %vm479_vm6, %v474_v24, %v476_v44  ;;  %v433_v50 = vsel %vm431_vm7, %v428_v45, %v430_v27  ;;  %v432_v51 = vsel %vm431_vm7, %v426_v23, %v428_v45 }
 0x1a0   : > { %511 = vmatprep.subr.mxu0 %v481_v46 }
 0x1a1   : > { %512 = vmatpush1.msra.mxu0 %v480_v47 }
 0x1a2   : > { %v415_v52 = vpop.permute.xlu1 %414  ;;  %709 = vmatprep.subr.msk.mxu0 %vm860_vm8, %v433_v50  ;;  %v465_v53 = vpop.permute.xlu0 %464 }
 0x1a3   : > { %v419_v54 = vsel %vm418_vm9, %v413_v30, %v415_v52  ;;  %v420_v55 = vsel %vm418_vm9, %v415_v52, %v417_v26  ;;  %710 = vmatpush1.msk.msra.mxu0 %vm864_vm10, %v432_v51  ;;  %v470_v56 = vsel %vm468_vm11, %v465_v53, %v467_v33  ;;  %v469_v59 = vsel %vm468_vm11, %v463_v29, %v465_v53 }
 0x1a4   : > { %711 = vmatprep.subr.msk.mxu0 %vm848_vm4, %v420_v55 }
 0x1a5   : > { %712 = vmatpush1.msk.msra.mxu0 %vm852_vm5, %v419_v54 }
 0x1a6   : > { %v402_v57 = vpop.permute.xlu1 %401  ;;  %517 = vmatprep.subr.mxu0 %v470_v56  ;;  %v389_v58 = vpop.permute.xlu0 %388 }
 0x1a7   : > { %v406_v60 = vsel %vm405_vm12, %v400_v36, %v402_v57  ;;  %v407_v61 = vsel %vm405_vm12, %v402_v57, %v404_v32  ;;  %518 = vmatpush1.msra.mxu0 %v469_v59  ;;  %v394_v62 = vsel %vm392_vm13, %v389_v58, %v391_v39  ;;  %v393_v63 = vsel %vm392_vm13, %v387_v35, %v389_v58 }
 0x1a8   : > { %713 = vmatprep.subr.msk.mxu0 %vm860_vm8, %v407_v61 }
 0x1a9   : > { %714 = vmatpush1.msk.msra.mxu0 %vm864_vm10, %v406_v60 }
 0x1aa   : > { %v454_v0 = vpop.permute.xlu1 %453  ;;  %715 = vmatprep.subr.msk.mxu0 %vm848_vm4, %v394_v62  ;;  %v456_v1 = vpop.permute.xlu0 %455 }
 0x1ab   : > { %716 = vmatpush1.msk.msra.mxu0 %vm852_vm5, %v393_v63  ;;  %v459_v2 = vsel %vm457_vm14, %v454_v0, %v456_v1 }
 0x1ac   : > { %523 = vmatprep.subr.mxu0 %v459_v2 }
 0x1ae   : > { %v452_v3 = vpop.permute.xlu1 %451 }
 0x1af   : > { %v458_v4 = vsel %vm457_vm14, %v452_v3, %v454_v0 }
 0x1b0   : > { %524 = vmatpush1.msra.mxu0 %v458_v4 }
 0x1b1   : > { %717 = vmatprep.subr.msk.mxu0 %vm860_vm8, %v825_v16 }
 0x1b2   : > { %718 = vmatpush1.msk.msra.mxu0 %vm864_vm10, %v827_v17 }
 0x1b3   : > { %719 = vmatmul.mubr.msk.f32.vlgmr.msra.gmra.mxu0 %vm491_vm15, %v484_v5 }
 0x1b7   : > { %v489_v6 = vpop.permute.xlu0 %488 }
 0x273   : > { %v561_v7 = vpop.f32.mrf.mxu0 }
 0x274   : > { %v562_v8 = vadd.f32 %v561_v7, %v489_v6 }
 0x275   : > { %v563_v9 = vpop.f32.mrf.mxu0 }
 0x276   : > { %577 = vst [vmem:[%s291_s28] sm:$0xff] %v562_v8  ;;  %v564_v10 = vadd.f32 %v563_v9, %v489_v6  ;;  %v571_v12 = vmul.f32 %v562_v8, %v562_v8 }
 0x278   : > { %578 = vst [vmem:[%s291_s28 + $0x8] sm:$0xff] %v564_v10  ;;  %v566_v11 = vadd.f32 %v564_v10, %v562_v8  ;;  %v572_v13 = vmul.f32 %v564_v10, %v564_v10 }
 0x27a   : > { %567 = vadd.xlane.f32.xlu1 %v566_v11  ;;  %v573_v14 = vadd.f32 %v572_v13, %v571_v12 }
 0x27c   : > { %574 = vadd.xlane.f32.xlu0 %v573_v14 }
 0x303   : > { %v568_v15 = vpop.xlane.xlu1 %567 }
 0x304   : > { %570 = vst.msk [vmem:[%s295_s10] sm:$0xff] %vm569_vm0, %v568_v15 }
 0x305   : > { %v575_v16 = vpop.xlane.xlu0 %574 }
 0x306   : > { %576 = vst.msk [vmem:[%s299_s12] sm:$0xff] %vm569_vm0, %v575_v16 }
 0x307 PF: > { %s18_s24 = sadd.s32 1, %s750_s24  }
 0x308   : > { %p15_p4 = scmp.ge.s32.totalorder %s18_s24, 4  }
 0x30a   :  { %17 = sbr.rel (!%p15_p4) target bundleno = 1 (0x1), region = 94 }

// kernel: up_cons_forward.3
= control target key start
LH: loop header
LB: loop body
LE: loop exit
PB: predicated region body
PF: predicated region fallthrough
CT: control target
= control target key end

     0   :  { %s806_s21 = smov 0   ;;  %s910_s0 = inlined_call_operand.vmem [shape: f32[2,4,256], index: 0, kind: input, shape index: {}]   ;;  %s911_s1 = inlined_call_operand.vmem [shape: f32[2,4,256], index: 1, kind: input, shape index: {}]   ;;  %s912_s2 = inlined_call_operand.vmem [shape: f32[8,72], index: 2, kind: input, shape index: {}]   ;;  %s913_s3 = inlined_call_operand.vmem [shape: f32[8,1], index: 3, kind: input, shape index: {}]   ;;  %s914_s4 = inlined_call_operand.vmem [shape: f32[2,8,256], index: 4, kind: output, shape index: {0}]   ;;  %s915_s5 = inlined_call_operand.vmem [shape: f32[2,8,1], index: 5, kind: output, shape index: {1}]   ;;  %s916_s6 = inlined_call_operand.vmem [shape: f32[2,8,1], index: 6, kind: output, shape index: {2}]  }
   0x1 LB: > { %s699_s22 = sadd.s32 4294967295, %s758_s21   ;;  %p703_p0 = scmp.ge.s32.totalorder %s758_s21, 1  ;;  %s758_s21 = sphi %s806_s21, %s17_s21  }
   0x2   : > { %p227_p1 = scmp.lt.s32.totalorder %s758_s21, 3 }
   0x4   : > { %p228_p2 = pnand %p703_p0, %p227_p1 }
   0x5   : > { %p270_p3 = scmp.lt.s32.totalorder (!%p228_p2), %s699_s22, 1  ;;  %s761_s30 = smov (!%p228_p2), 17  }
   0x6   : > { %231 = sbr.rel (%p228_p2) target bundleno = 648 (0x288), region = 36  ;;  %s762_s7 = smov (!%p228_p2), 94  }
   0x7   : > { %s763_s8 = smov (!%p228_p2), 95   ;;  %s764_s9 = smov (!%p228_p2), 96  }
   0x8   : > { %s765_s10 = smov (!%p228_p2), 110   ;;  %s766_s11 = smov (!%p228_p2), 111  }
   0x9   : > { %s767_s12 = smov (!%p228_p2), 112   ;;  %s768_s13 = smov (!%p228_p2), 126  }
   0xa   : > { %s770_s14 = smov (!%p228_p2), 127  }
   0xb   : > { %vm295_vm0 = vcmask 277504   ;;  %v760_v0 = vmov 0.0   ;;  %s926_s22 = smov (!%p270_p3, %s699_s22), 1  ;;  %vm309_vm1 = vcmask 1043592   ;;  %vm325_vm2 = vcmask 1047692   ;;  %v476_v15 = vld [vmem:[%s913_s3] sm:$0xff] }
   0xc   : > { %293 = vst [vmem:[#allocation2] sm:$0xff] %v760_v0  ;;  %294 = vst [vmem:[#allocation2 + $0x8] sm:$0xff] %v760_v0  ;;  %550 = vmatprep.mubr.f32.mxu0 %v760_v0  ;;  %s817_s23 = sshll.u32 %s926_s22, 3  ;;  %vm304_vm3 = vcmask 138240   ;;  %vm312_vm4 = vcmask 134144   ;;  %vm328_vm5 = vcmask 138244   ;;  %v330_v21 = vlaneseq }
   0xd   : > { %296 = vst.msk [vmem:[#allocation2 + $0x10] sm:$0xff] %vm295_vm0, %v760_v0  ;;  %s274_s26 = scalar_lea.vmem %s910_s0, %s817_s23  ;;  %s279_s29 = scalar_lea.vmem %s911_s1, %s817_s23  ;;  %v769_v14 = vmov 0   ;;  %vm435_vm6 = vcmask 769024   ;;  %vm470_vm9 = vcmask 777216   ;;  %vm422_vm10 = vcmask 785408  }
   0xe   : > { %v297_v1 = vld [vmem:[%s274_s26] sm:$0xff]  ;;  %749 = vset.pattern.permute.xlu0 %v769_v14  ;;  %v331_v24 = vand.u32 127, %v330_v21  ;;  %vm409_vm12 = vcmask 900096   ;;  %vm459_vm14 = vcmask 908288   ;;  %vm396_vm15 = vcmask 916480   ;;  %s729_s19 = sshll.u32 %s926_s22, 4  ;;  %s288_s27 = scalar_lea.vmem %s915_s5, %s817_s23 }
   0xf   : > { %v314_v2 = vld [vmem:[%s279_s29] sm:$0xff]  ;;  %300 = vrot.lane.b32.xlu0 %v297_v1, %s761_s30  ;;  %v299_v3 = vcombine.high %v297_v1, %v297_v1  ;;  %vm383_vm0 = vcmask 1031168   ;;  %s284_s25 = scalar_lea.vmem %s914_s4, %s729_s19 }
  0x10   : > { %v316_v4 = vcombine.low %v314_v2, %v314_v2  ;;  %v332_v27 = vadd.s32 128, %v331_v24  ;;  %v337_v33 = vand.u32 15, %v331_v24  ;;  %v475_v1 = vld [vmem:[%s912_s2] sm:$0xff] }
  0x12   : > { %317 = vrot.lane.b32.xlu1 %v316_v4, %s761_s30  ;;  %v344_v30 = vand.u32 15, %v332_v27  ;;  %vm854_vm8 = vcmp.le.s32.totalorder %v337_v33, 14  ;;  %vm866_vm13 = vcmp.ge.s32.totalorder %v337_v33, 1 }
  0x13   : > { %302 = vrot.lane.b32.xlu0 %v299_v3, %s761_s30 }
  0x14   : > { %vm850_vm7 = vcmp.le.s32.totalorder %v344_v30, 14  ;;  %vm862_vm11 = vcmp.ge.s32.totalorder %v344_v30, 1 }
  0x16   : > { %319 = vrot.lane.b32.xlu1 %v314_v2, %s761_s30  ;;  %s292_s30 = scalar_lea.vmem %s916_s6, %s817_s23 }
  0x81   : > { %v301_v5 = vpop.permute.xlu0 %300 }
  0x82   : > { %310 = vst.msk [vmem:[#allocation2] sm:$0xf] %vm309_vm1, %v301_v5  ;;  %vm448_vm1 = vcmask 1039360  }
  0x84   : > { %v318_v6 = vpop.permute.xlu1 %317 }
  0x85   : > { %326 = vst.msk [vmem:[#allocation2] sm:$0xf0] %vm325_vm2, %v318_v6  ;;  %v303_v7 = vpop.permute.xlu0 %302  ;;  %vm482_vm2 = vcmask 588800  }
  0x86   : > { %v305_v8 = vsel %vm304_vm3, %v301_v5, %v303_v7  ;;  %313 = vst.msk [vmem:[#allocation2 + $0x10] sm:$0xf] %vm312_vm4, %v303_v7 }
  0x87   : > { %311 = vst [vmem:[#allocation2 + $0x8] sm:$0xf] %v305_v8 }
  0x88   : > { %v320_v9 = vpop.permute.xlu1 %319 }
  0x89   : > { %v321_v10 = vsel %vm304_vm3, %v318_v6, %v320_v9  ;;  %329 = vst.msk [vmem:[#allocation2 + $0x10] sm:$0xf0] %vm328_vm5, %v320_v9  ;;  %vm560_vm3 = vcmask 7168  }
  0x8a   : > { %327 = vst [vmem:[#allocation2 + $0x8] sm:$0xf0] %v321_v10 }
  0x8c   : > { %v827_v11 = vld [vmem:[#allocation2] sm:$0xff] }
  0x8d   : > { %429 = vrot.lane.b32.xlu0 %v827_v11, %s762_s7 }
  0x90   : > { %v369_v12 = vld [vmem:[#allocation2 + $0x10] sm:$0xff] }
  0x91   : > { %468 = vrot.lane.b32.xlu0 %v369_v12, %s763_s8  ;;  %433 = vrot.lane.b32.xlu1 %v369_v12, %s762_s7  ;;  %v836_v13 = vld [vmem:[#allocation2 + $0x8] sm:$0xff] }
  0x95   : > { %416 = vrot.lane.b32.xlu0 %v827_v11, %s764_s9  ;;  %464 = vrot.lane.b32.xlu1 %v827_v11, %s763_s8 }
  0x99   : > { %407 = vrot.lane.b32.xlu0 %v369_v12, %s765_s10  ;;  %420 = vrot.lane.b32.xlu1 %v369_v12, %s764_s9 }
  0x9d   : > { %453 = vrot.lane.b32.xlu0 %v827_v11, %s766_s11  ;;  %403 = vrot.lane.b32.xlu1 %v827_v11, %s765_s10 }
  0xa1   : > { %394 = vrot.lane.b32.xlu0 %v369_v12, %s767_s12  ;;  %457 = vrot.lane.b32.xlu1 %v369_v12, %s766_s11 }
  0xa5   : > { %377 = vrot.lane.b32.xlu0 %v827_v11, %s768_s13  ;;  %390 = vrot.lane.b32.xlu1 %v827_v11, %s767_s12 }
  0xa9   : > { %381 = vrot.lane.b32.xlu1 %v369_v12, %s768_s13  ;;  %431 = vrot.lane.b32.xlu0 %v836_v13, %s762_s7 }
  0xad   : > { %466 = vrot.lane.b32.xlu1 %v836_v13, %s763_s8  ;;  %418 = vrot.lane.b32.xlu0 %v836_v13, %s764_s9 }
  0xb1   : > { %405 = vrot.lane.b32.xlu1 %v836_v13, %s765_s10  ;;  %455 = vrot.lane.b32.xlu0 %v836_v13, %s766_s11 }
  0xb5   : > { %392 = vrot.lane.b32.xlu1 %v836_v13, %s767_s12  ;;  %379 = vrot.lane.b32.xlu0 %v836_v13, %s768_s13 }
  0xb9   : > { %444 = vrot.lane.b32.xlu1 %v836_v13, %s770_s14  ;;  %446 = vrot.lane.b32.xlu0 %v369_v12, %s770_s14 }
  0xbd   : > { %442 = vrot.lane.b32.xlu1 %v827_v11, %s770_s14  ;;  %479 = vperm.xlu0 %749, %v476_v15  }
  0xff   : > { %v430_v16 = vpop.permute.xlu0 %429 }
 0x103   : > { %v434_v17 = vpop.permute.xlu1 %433  ;;  %v469_v18 = vpop.permute.xlu0 %468 }
 0x107   : > { %v465_v19 = vpop.permute.xlu1 %464  ;;  %v417_v20 = vpop.permute.xlu0 %416 }
 0x10b   : > { %v421_v22 = vpop.permute.xlu1 %420  ;;  %v408_v23 = vpop.permute.xlu0 %407 }
 0x10f   : > { %v404_v25 = vpop.permute.xlu1 %403  ;;  %v454_v26 = vpop.permute.xlu0 %453 }
 0x113   : > { %v458_v28 = vpop.permute.xlu1 %457  ;;  %v395_v29 = vpop.permute.xlu0 %394 }
 0x117   : > { %v391_v31 = vpop.permute.xlu1 %390  ;;  %v378_v32 = vpop.permute.xlu0 %377 }
 0x11b   : > { %v382_v35 = vpop.permute.xlu1 %381  ;;  %v432_v36 = vpop.permute.xlu0 %431 }
 0x11c   : > { %v437_v38 = vsel %vm435_vm6, %v432_v36, %v434_v17  ;;  %v436_v39 = vsel %vm435_vm6, %v430_v16, %v432_v36 }
 0x11d   : > { %712 = vmatprep.subr.msk.mxu0 %vm850_vm7, %v437_v38 }
 0x11e   : > { %713 = vmatpush1.msk.msra.mxu0 %vm854_vm8, %v436_v39 }
 0x11f   : > { %v467_v40 = vpop.permute.xlu1 %466  ;;  %v419_v41 = vpop.permute.xlu0 %418 }
 0x120   : > { %v472_v42 = vsel %vm470_vm9, %v467_v40, %v469_v18  ;;  %v471_v43 = vsel %vm470_vm9, %v465_v19, %v467_v40  ;;  %v424_v46 = vsel %vm422_vm10, %v419_v41, %v421_v22  ;;  %v423_v47 = vsel %vm422_vm10, %v417_v20, %v419_v41 }
 0x121   : > { %502 = vmatprep.subr.mxu0 %v472_v42 }
 0x122   : > { %503 = vmatpush1.msra.mxu0 %v471_v43 }
 0x123   : > { %v406_v48 = vpop.permute.xlu1 %405  ;;  %714 = vmatprep.subr.msk.mxu0 %vm862_vm11, %v424_v46  ;;  %v456_v49 = vpop.permute.xlu0 %455 }
 0x124   : > { %v410_v50 = vsel %vm409_vm12, %v404_v25, %v406_v48  ;;  %v411_v51 = vsel %vm409_vm12, %v406_v48, %v408_v23  ;;  %715 = vmatpush1.msk.msra.mxu0 %vm866_vm13, %v423_v47  ;;  %v461_v52 = vsel %vm459_vm14, %v456_v49, %v458_v28  ;;  %v460_v55 = vsel %vm459_vm14, %v454_v26, %v456_v49 }
 0x125   : > { %716 = vmatprep.subr.msk.mxu0 %vm850_vm7, %v411_v51 }
 0x126   : > { %717 = vmatpush1.msk.msra.mxu0 %vm854_vm8, %v410_v50 }
 0x127   : > { %v393_v53 = vpop.permute.xlu1 %392  ;;  %508 = vmatprep.subr.mxu0 %v461_v52  ;;  %v380_v54 = vpop.permute.xlu0 %379 }
 0x128   : > { %v397_v56 = vsel %vm396_vm15, %v391_v31, %v393_v53  ;;  %v398_v57 = vsel %vm396_vm15, %v393_v53, %v395_v29  ;;  %509 = vmatpush1.msra.mxu0 %v460_v55  ;;  %v385_v58 = vsel %vm383_vm0, %v380_v54, %v382_v35  ;;  %v384_v59 = vsel %vm383_vm0, %v378_v32, %v380_v54 }
 0x129   : > { %718 = vmatprep.subr.msk.mxu0 %vm862_vm11, %v398_v57 }
 0x12a   : > { %719 = vmatpush1.msk.msra.mxu0 %vm866_vm13, %v397_v56 }
 0x12b   : > { %v445_v60 = vpop.permute.xlu1 %444  ;;  %720 = vmatprep.subr.msk.mxu0 %vm850_vm7, %v385_v58  ;;  %v447_v61 = vpop.permute.xlu0 %446 }
 0x12c   : > { %721 = vmatpush1.msk.msra.mxu0 %vm854_vm8, %v384_v59  ;;  %v450_v62 = vsel %vm448_vm1, %v445_v60, %v447_v61 }
 0x12d   : > { %514 = vmatprep.subr.mxu0 %v450_v62 }
 0x12f   : > { %v443_v63 = vpop.permute.xlu1 %442 }
 0x130   : > { %v449_v0 = vsel %vm448_vm1, %v443_v63, %v445_v60 }
 0x131   : > { %515 = vmatpush1.msra.mxu0 %v449_v0 }
 0x132   : > { %722 = vmatprep.subr.msk.mxu0 %vm862_vm11, %v836_v13 }
 0x133   : > { %723 = vmatpush1.msk.msra.mxu0 %vm866_vm13, %v827_v11 }
 0x134   : > { %724 = vmatmul.mubr.msk.f32.vlgmr.msra.gmra.mxu0 %vm482_vm2, %v475_v1 }
 0x138   : > { %v480_v2 = vpop.permute.xlu0 %479 }
 0x1f4   : > { %v552_v3 = vpop.f32.mrf.mxu0 }
 0x1f5   : > { %v553_v4 = vadd.f32 %v552_v3, %v480_v2 }
 0x1f6   : > { %v554_v5 = vpop.f32.mrf.mxu0 }
 0x1f7   : > { %v555_v6 = vadd.f32 %v554_v5, %v480_v2  ;;  %568 = vst [vmem:[%s284_s25] sm:$0xff] %v553_v4  ;;  %v562_v8 = vmul.f32 %v553_v4, %v553_v4 }
 0x1f9   : > { %569 = vst [vmem:[%s284_s25 + $0x8] sm:$0xff] %v555_v6  ;;  %v557_v7 = vadd.f32 %v555_v6, %v553_v4  ;;  %v563_v9 = vmul.f32 %v555_v6, %v555_v6 }
 0x1fb   : > { %558 = vadd.xlane.f32.xlu1 %v557_v7  ;;  %v564_v10 = vadd.f32 %v563_v9, %v562_v8 }
 0x1fd   : > { %565 = vadd.xlane.f32.xlu0 %v564_v10 }
 0x284   : > { %v559_v11 = vpop.xlane.xlu1 %558 }
 0x285   : > { %561 = vst.msk [vmem:[%s288_s27] sm:$0xff] %vm560_vm3, %v559_v11 }
 0x286   : > { %v566_v12 = vpop.xlane.xlu0 %565 }
 0x287   : > { %567 = vst.msk [vmem:[%s292_s30] sm:$0xff] %vm560_vm3, %v566_v12 }
 0x288 PF: > { %s17_s21 = sadd.s32 1, %s758_s21  }
 0x289   : > { %p14_p4 = scmp.ge.s32.totalorder %s17_s21, 4  }
 0x28b   :  { %16 = sbr.rel (!%p14_p4) target bundleno = 1 (0x1), region = 93 }

</bundles_post_ra>
